<compile_context>
chip_gen: v5e
topology: v5e:2x2
jax: 0.10.0
libtpu: 0.0.40
codegen_flags: <defaults>
</compile_context>

<pallas_src>
import functools

import jax
import jax.numpy as jnp
from jax import lax
from jax.experimental import pallas as pl
from jax.experimental.pallas import tpu as pltpu

BN_EPS = 1e-5


def _round_up(x, m):
    return (x + m - 1) // m * m


def _fused_kernel(mask_ref, gb_ref, x_ref, w_ref, o_ref, xpad_sc, sb_sc,
                  *, width, cout, count, halo, block_batch):
    # grid = (phase, batch_block), both "arbitrary".
    #   mask_ref : (2, P)                 f32 column masks [left-ok, right-ok]
    #   gb_ref   : (2*Cout, 1)            f32 [gamma | beta]
    #   x_ref    : (B, Cin_pad, P)        f32 samples, channels on sublanes, H*W on lanes
    #   w_ref    : (2*Cout, 9*Cin_pad)    f32 [3x3 taps | 1x1 shortcut on center tap]
    #   o_ref    : (B, Cout, P)           f32 output block
    #   xpad_sc  : (B, Cin_pad, P+2*halo) VMEM scratch with zero halo columns
    #   sb_sc    : (2*Cout, 1)            VMEM scratch: [s1|s2] in phase 0, [scale|bias] after
    phase = pl.program_id(0)
    bi = pl.program_id(1)
    nb = pl.num_programs(1)
    p = o_ref.shape[-1]

    @pl.when(jnp.logical_and(phase == 0, bi == 0))
    def _init():
        xpad_sc[...] = jnp.zeros_like(xpad_sc)   # zero the halo once; middle overwritten below
        sb_sc[...] = jnp.zeros_like(sb_sc)

    # Stage the current batch block into the zero-haloed scratch (no per-step concat/copy
    # of a fresh padded buffer).
    xpad_sc[:, :, halo:halo + p] = x_ref[...]

    mask = mask_ref[...]
    ok_left = mask[0:1, :]       # valid when dx == -1
    ok_right = mask[1:2, :]      # valid when dx == +1

    # im2col via masked flat shifts.  Cin_pad is a multiple of 8, so every tap piece is a
    # whole-sublane (Cin_pad, P) tile and the axis-0 stack is a plain tile stack.
    per_sample = []
    for b in range(block_batch):
        xw = xpad_sc[b]                                        # (Cin_pad, P + 2*halo)
        taps = []
        for ky in range(3):
            for kx in range(3):
                dy, dx = ky - 1, kx - 1
                s = dy * width + dx
                sl = xw[:, halo + s: halo + s + p]             # (Cin_pad, P) static slice
                if dx == -1:
                    sl = sl * ok_left
                elif dx == 1:
                    sl = sl * ok_right
                taps.append(sl)
        per_sample.append(jnp.concatenate(taps, axis=0))       # (9*Cin_pad, P)
    pat = jnp.concatenate(per_sample, axis=-1)                 # (9*Cin_pad, B*P)

    # One MXU matmul for main conv AND shortcut.  Recomputed in both phases instead of
    # round-tripping a (2*Cout, B*P) f32 intermediate through HBM.
    acc = jnp.dot(w_ref[...], pat, preferred_element_type=jnp.float32)   # (2*Cout, B*P)
    main = acc[:cout, :]

    @pl.when(phase == 0)
    def _accumulate_stats():
        s1 = jnp.sum(main, axis=1, keepdims=True)              # (Cout, 1)
        s2 = jnp.sum(main * main, axis=1, keepdims=True)       # (Cout, 1)
        sb_sc[...] += jnp.concatenate([s1, s2], axis=0)

    @pl.when(jnp.logical_and(phase == 0, bi == nb - 1))
    def _fold_scale_bias():
        st = sb_sc[...]
        mean = st[:cout, :] * (1.0 / count)
        var = jnp.maximum(st[cout:, :] * (1.0 / count) - mean * mean, 0.0)
        gb = gb_ref[...]
        scale = gb[:cout, :] * lax.rsqrt(var + BN_EPS)
        bias = gb[cout:, :] - mean * scale
        sb_sc[...] = jnp.concatenate([scale, bias], axis=0)

    @pl.when(phase == 1)
    def _normalize_add_relu():
        sb = sb_sc[...]
        scale = sb[:cout, :]
        bias = sb[cout:, :]
        short = acc[cout:, :]
        y = jnp.maximum(main * scale + bias, 0.0)
        out = jnp.maximum(y + short, 0.0)                      # (Cout, B*P)
        for b in range(block_batch):
            o_ref[b] = out[:, b * p:(b + 1) * p].astype(o_ref.dtype)


@jax.jit
def residual_block(x_nchw, w3, gamma, beta, w1):
    """x_nchw: (N, Cin, H, W) f32.  w3: (3,3,Cin,Cout).  w1: (Cin,Cout).  -> (N, Cout, H, W)."""
    N, Cin, H, W = x_nchw.shape
    Cout = w3.shape[-1]
    P = H * W
    Cin_pad = _round_up(Cin, 8)
    HALO = _round_up(W + 1, 128)

    # Free reshape (no transpose): channels on sublanes, flattened spatial on lanes.
    # Pad Cin to a sublane multiple so the in-kernel im2col stack needs no repacking.
    x_flat = x_nchw.reshape(N, Cin, P).astype(jnp.float32)
    if Cin_pad != Cin:
        x_flat = jnp.pad(x_flat, ((0, 0), (0, Cin_pad - Cin), (0, 0)))

    # Fused weight slab (tiny; in a real model this would be folded once at load time):
    # rows [0:Cout] = 3x3 taps, rows [Cout:2*Cout] = 1x1 shortcut on the center-tap columns.
    wt = jnp.transpose(w3, (3, 0, 1, 2))                                  # (Cout, 3, 3, Cin)
    wt = jnp.pad(wt, ((0, 0), (0, 0), (0, 0), (0, Cin_pad - Cin)))
    w_main = wt.reshape(Cout, 9 * Cin_pad)
    w_short = jnp.zeros((Cout, 9 * Cin_pad), w_main.dtype)
    w_short = w_short.at[:, 4 * Cin_pad:4 * Cin_pad + Cin].set(w1.T)
    w_slab = jnp.concatenate([w_main, w_short], axis=0).astype(jnp.float32)

    # Column-validity masks, hoisted out of the kernel body (constant index_map input).
    col = jnp.arange(P, dtype=jnp.int32) % W
    mask = jnp.stack([(col >= 1), (col <= W - 2)]).astype(jnp.float32)    # (2, P)

    gb = jnp.concatenate([gamma, beta], axis=0).reshape(2 * Cout, 1).astype(jnp.float32)

    # Batch-block size from a VMEM budget (keeps headroom for 64 MiB-VMEM v7x).
    bytes_per_sample = 4 * (Cin_pad * (P + 2 * HALO)      # zero-halo scratch
                            + 9 * Cin_pad * P             # im2col slab
                            + 2 * 2 * Cin_pad * P         # double-buffered x
                            + 2 * Cout * P                # acc
                            + 2 * 2 * Cout * P)           # double-buffered out
    budget = 24 * 1024 * 1024
    B = max(1, min(N, budget // max(bytes_per_sample, 1)))
    while N % B:
        B -= 1
    NB = N // B

    kernel = functools.partial(_fused_kernel, width=W, cout=Cout,
                               count=float(N * P), halo=HALO, block_batch=B)

    out_flat = pl.pallas_call(
        kernel,
        grid_spec=pltpu.PrefetchScalarGridSpec(
            num_scalar_prefetch=0,
            grid=(2, NB),                                   # (phase, batch block)
            in_specs=[
                pl.BlockSpec((2, P), lambda ph, i: (0, 0)),
                pl.BlockSpec((2 * Cout, 1), lambda ph, i: (0, 0)),
                pl.BlockSpec((B, Cin_pad, P), lambda ph, i: (i, 0, 0)),
                pl.BlockSpec((2 * Cout, 9 * Cin_pad), lambda ph, i: (0, 0)),
            ],
            out_specs=pl.BlockSpec((B, Cout, P), lambda ph, i: (i, 0, 0)),
            scratch_shapes=[
                pltpu.VMEM((B, Cin_pad, P + 2 * HALO), jnp.float32),
                pltpu.VMEM((2 * Cout, 1), jnp.float32),
            ],
        ),
        out_shape=jax.ShapeDtypeStruct((N, Cout, P), jnp.float32),
        compiler_params=pltpu.CompilerParams(
            dimension_semantics=("arbitrary", "arbitrary"),  # phase 1 depends on all of phase 0
            vmem_limit_bytes=32 * 1024 * 1024,
        ),
    )(mask, gb, x_flat, w_slab)

    return out_flat.reshape(N, Cout, H, W)                   # free reshape back to NCHW


def reference(x_nchw, w3, gamma, beta, w1):
    """Pure-JAX reference (XLA conv) for the correctness check."""
    conv = lax.conv_general_dilated(
        x_nchw, jnp.transpose(w3, (3, 2, 0, 1)),                 # OIHW
        window_strides=(1, 1), padding=((1, 1), (1, 1)),
        dimension_numbers=('NCHW', 'OIHW', 'NCHW'))
    mean = jnp.mean(conv, axis=(0, 2, 3), keepdims=True)
    var = jnp.mean((conv - mean) ** 2, axis=(0, 2, 3), keepdims=True)
    y = (conv - mean) * lax.rsqrt(var + BN_EPS)
    y = y * gamma.reshape(1, -1, 1, 1) + beta.reshape(1, -1, 1, 1)
    y = jnp.maximum(y, 0.0)
    sc = lax.conv_general_dilated(
        x_nchw, jnp.transpose(w1, (1, 0))[:, :, None, None],     # OIHW 1x1
        window_strides=(1, 1), padding=((0, 0), (0, 0)),
        dimension_numbers=('NCHW', 'OIHW', 'NCHW'))
    return jnp.maximum(y + sc, 0.0)


if __name__ == "__main__":
    # ResidualBlock(in_channels=4, out_channels=8, num_convs=1)
    N, Cin, Cout, H, W = 2, 4, 8, 16, 16

    key = jax.random.PRNGKey(0)
    k_x, k_w3, k_w1 = jax.random.split(key, 3)

    x = jax.random.normal(k_x, (N, Cin, H, W), dtype=jnp.float32)
    w3 = jax.random.normal(k_w3, (3, 3, Cin, Cout), dtype=jnp.float32) * 0.1
    w1 = jax.random.normal(k_w1, (Cin, Cout), dtype=jnp.float32) * 0.1
    gamma = jnp.ones((Cout,), dtype=jnp.float32)    # nn.BatchNorm2d default weight
    beta = jnp.zeros((Cout,), dtype=jnp.float32)    # nn.BatchNorm2d default bias

    out = jax.block_until_ready(residual_block(x, w3, gamma, beta, w1))
    ref = jax.block_until_ready(reference(x, w3, gamma, beta, w1))

    assert out.shape == (N, Cout, H, W)
    assert jnp.allclose(out, ref, rtol=2e-3, atol=2e-3)

    print("KERNEL_OK")
</pallas_src>

<mosaic_0001>
module attributes {stable_mosaic.version = 11 : i64} {
  func.func @_fused_kernel(%arg0: i32, %arg1: i32, %arg2: memref<2x256xf32, #tpu.memory_space<vmem>>, %arg3: memref<16x1xf32, #tpu.memory_space<vmem>>, %arg4: memref<2x8x256xf32, #tpu.memory_space<vmem>>, %arg5: memref<16x72xf32, #tpu.memory_space<vmem>>, %arg6: memref<2x8x256xf32, #tpu.memory_space<vmem>>, %arg7: memref<2x8x512xf32, #tpu.memory_space<vmem>>, %arg8: memref<16x1xf32, #tpu.memory_space<vmem>>) attributes {dimension_semantics = [#tpu.dimension_semantics<arbitrary>, #tpu.dimension_semantics<arbitrary>], iteration_bounds = array<i64: 2, 1>, scalar_prefetch = 0 : i64, scratch_operands = 2 : i64, tpu.core_type = #tpu.core_type<tc>, window_params = [{pipeline_mode = #tpu.pipeline_mode<synchronous>, transform_indices = @transform_0, window_bounds = array<i64: 2, 256>}, {pipeline_mode = #tpu.pipeline_mode<synchronous>, transform_indices = @transform_1, window_bounds = array<i64: 16, 1>}, {transform_indices = @transform_2, window_bounds = array<i64: 2, 8, 256>}, {pipeline_mode = #tpu.pipeline_mode<synchronous>, transform_indices = @transform_3, window_bounds = array<i64: 16, 72>}, {transform_indices = @transform_4, window_bounds = array<i64: 2, 8, 256>}]} {
    %c0_i32 = arith.constant 0 : i32
    %0 = arith.cmpi eq, %arg0, %c0_i32 : i32
    %c0_i32_0 = arith.constant 0 : i32
    %1 = arith.cmpi eq, %arg1, %c0_i32_0 : i32
    %2 = arith.andi %0, %1 : i1
    %3 = arith.extui %2 : i1 to i32
    %c0_i32_1 = arith.constant 0 : i32
    %4 = arith.cmpi ne, %3, %c0_i32_1 : i32
    scf.if %4 {
      %cst_21 = arith.constant 0.000000e+00 : f32
      %73 = vector.broadcast %cst_21 : f32 to vector<2x8x512xf32>
      %c0_22 = arith.constant 0 : index
      %c0_23 = arith.constant 0 : index
      %c0_24 = arith.constant 0 : index
      %74 = vector.load %arg7[%c0_22, %c0_23, %c0_24] : memref<2x8x512xf32, #tpu.memory_space<vmem>>, vector<2x8x512xf32>
      tpu.vector_store %arg7[%c0_22, %c0_23, %c0_24], %73 {strides = array<i32>} : memref<2x8x512xf32, #tpu.memory_space<vmem>>, vector<2x8x512xf32>,
      %cst_25 = arith.constant 0.000000e+00 : f32
      %75 = vector.broadcast %cst_25 : f32 to vector<16x1xf32>
      %c0_26 = arith.constant 0 : index
      %c0_27 = arith.constant 0 : index
      %76 = vector.load %arg8[%c0_26, %c0_27] : memref<16x1xf32, #tpu.memory_space<vmem>>, vector<16x1xf32>
      tpu.vector_store %arg8[%c0_26, %c0_27], %75 {strides = array<i32>} : memref<16x1xf32, #tpu.memory_space<vmem>>, vector<16x1xf32>,
    } else {
    }
    %c0 = arith.constant 0 : index
    %c0_2 = arith.constant 0 : index
    %c0_3 = arith.constant 0 : index
    %5 = vector.load %arg4[%c0, %c0_2, %c0_3] : memref<2x8x256xf32, #tpu.memory_space<vmem>>, vector<2x8x256xf32>
    %c0_4 = arith.constant 0 : index
    %c0_5 = arith.constant 0 : index
    %c128 = arith.constant 128 : index
    %6 = vector.load %arg7[%c0_4, %c0_5, %c128] : memref<2x8x512xf32, #tpu.memory_space<vmem>>, vector<2x8x256xf32>
    tpu.vector_store %arg7[%c0_4, %c0_5, %c128], %5 {strides = array<i32>} : memref<2x8x512xf32, #tpu.memory_space<vmem>>, vector<2x8x256xf32>,
    %c0_6 = arith.constant 0 : index
    %c0_7 = arith.constant 0 : index
    %7 = vector.load %arg2[%c0_6, %c0_7] : memref<2x256xf32, #tpu.memory_space<vmem>>, vector<2x256xf32>
    %8 = vector.extract_strided_slice %7 {offsets = [0, 0], sizes = [1, 256], strides = [1, 1]} : vector<2x256xf32> to vector<1x256xf32>
    %9 = vector.extract_strided_slice %7 {offsets = [1, 0], sizes = [1, 256], strides = [1, 1]} : vector<2x256xf32> to vector<1x256xf32>
    %c0_8 = arith.constant 0 : index
    %c0_9 = arith.constant 0 : index
    %c0_10 = arith.constant 0 : index
    %10 = vector.load %arg7[%c0_8, %c0_9, %c0_10] : memref<2x8x512xf32, #tpu.memory_space<vmem>>, vector<1x8x512xf32>
    %11 = vector.shape_cast %10 : vector<1x8x512xf32> to vector<8x512xf32>
    %12 = vector.extract_strided_slice %11 {offsets = [0, 111], sizes = [8, 256], strides = [1, 1]} : vector<8x512xf32> to vector<8x256xf32>
    %13 = vector.broadcast %8 : vector<1x256xf32> to vector<8x256xf32>
    %14 = arith.mulf %12, %13 : vector<8x256xf32>
    %15 = vector.extract_strided_slice %11 {offsets = [0, 112], sizes = [8, 256], strides = [1, 1]} : vector<8x512xf32> to vector<8x256xf32>
    %16 = vector.extract_strided_slice %11 {offsets = [0, 113], sizes = [8, 256], strides = [1, 1]} : vector<8x512xf32> to vector<8x256xf32>
    %17 = vector.broadcast %9 : vector<1x256xf32> to vector<8x256xf32>
    %18 = arith.mulf %16, %17 : vector<8x256xf32>
    %19 = vector.extract_strided_slice %11 {offsets = [0, 127], sizes = [8, 256], strides = [1, 1]} : vector<8x512xf32> to vector<8x256xf32>
    %20 = vector.broadcast %8 : vector<1x256xf32> to vector<8x256xf32>
    %21 = arith.mulf %19, %20 : vector<8x256xf32>
    %22 = vector.extract_strided_slice %11 {offsets = [0, 128], sizes = [8, 256], strides = [1, 1]} : vector<8x512xf32> to vector<8x256xf32>
    %23 = vector.extract_strided_slice %11 {offsets = [0, 129], sizes = [8, 256], strides = [1, 1]} : vector<8x512xf32> to vector<8x256xf32>
    %24 = vector.broadcast %9 : vector<1x256xf32> to vector<8x256xf32>
    %25 = arith.mulf %23, %24 : vector<8x256xf32>
    %26 = vector.extract_strided_slice %11 {offsets = [0, 143], sizes = [8, 256], strides = [1, 1]} : vector<8x512xf32> to vector<8x256xf32>
    %27 = vector.broadcast %8 : vector<1x256xf32> to vector<8x256xf32>
    %28 = arith.mulf %26, %27 : vector<8x256xf32>
    %29 = vector.extract_strided_slice %11 {offsets = [0, 144], sizes = [8, 256], strides = [1, 1]} : vector<8x512xf32> to vector<8x256xf32>
    %30 = vector.extract_strided_slice %11 {offsets = [0, 145], sizes = [8, 256], strides = [1, 1]} : vector<8x512xf32> to vector<8x256xf32>
    %31 = vector.broadcast %9 : vector<1x256xf32> to vector<8x256xf32>
    %32 = arith.mulf %30, %31 : vector<8x256xf32>
    %33 = tpu.concatenate %14, %15, %18, %21, %22, %25, %28, %29, %32 in 0 : vector<8x256xf32>, vector<8x256xf32>, vector<8x256xf32>, vector<8x256xf32>, vector<8x256xf32>, vector<8x256xf32>, vector<8x256xf32>, vector<8x256xf32>, vector<8x256xf32> -> vector<72x256xf32>
    %c1 = arith.constant 1 : index
    %c0_11 = arith.constant 0 : index
    %c0_12 = arith.constant 0 : index
    %34 = vector.load %arg7[%c1, %c0_11, %c0_12] : memref<2x8x512xf32, #tpu.memory_space<vmem>>, vector<1x8x512xf32>
    %35 = vector.shape_cast %34 : vector<1x8x512xf32> to vector<8x512xf32>
    %36 = vector.extract_strided_slice %35 {offsets = [0, 111], sizes = [8, 256], strides = [1, 1]} : vector<8x512xf32> to vector<8x256xf32>
    %37 = vector.broadcast %8 : vector<1x256xf32> to vector<8x256xf32>
    %38 = arith.mulf %36, %37 : vector<8x256xf32>
    %39 = vector.extract_strided_slice %35 {offsets = [0, 112], sizes = [8, 256], strides = [1, 1]} : vector<8x512xf32> to vector<8x256xf32>
    %40 = vector.extract_strided_slice %35 {offsets = [0, 113], sizes = [8, 256], strides = [1, 1]} : vector<8x512xf32> to vector<8x256xf32>
    %41 = vector.broadcast %9 : vector<1x256xf32> to vector<8x256xf32>
    %42 = arith.mulf %40, %41 : vector<8x256xf32>
    %43 = vector.extract_strided_slice %35 {offsets = [0, 127], sizes = [8, 256], strides = [1, 1]} : vector<8x512xf32> to vector<8x256xf32>
    %44 = vector.broadcast %8 : vector<1x256xf32> to vector<8x256xf32>
    %45 = arith.mulf %43, %44 : vector<8x256xf32>
    %46 = vector.extract_strided_slice %35 {offsets = [0, 128], sizes = [8, 256], strides = [1, 1]} : vector<8x512xf32> to vector<8x256xf32>
    %47 = vector.extract_strided_slice %35 {offsets = [0, 129], sizes = [8, 256], strides = [1, 1]} : vector<8x512xf32> to vector<8x256xf32>
    %48 = vector.broadcast %9 : vector<1x256xf32> to vector<8x256xf32>
    %49 = arith.mulf %47, %48 : vector<8x256xf32>
    %50 = vector.extract_strided_slice %35 {offsets = [0, 143], sizes = [8, 256], strides = [1, 1]} : vector<8x512xf32> to vector<8x256xf32>
    %51 = vector.broadcast %8 : vector<1x256xf32> to vector<8x256xf32>
    %52 = arith.mulf %50, %51 : vector<8x256xf32>
    %53 = vector.extract_strided_slice %35 {offsets = [0, 144], sizes = [8, 256], strides = [1, 1]} : vector<8x512xf32> to vector<8x256xf32>
    %54 = vector.extract_strided_slice %35 {offsets = [0, 145], sizes = [8, 256], strides = [1, 1]} : vector<8x512xf32> to vector<8x256xf32>
    %55 = vector.broadcast %9 : vector<1x256xf32> to vector<8x256xf32>
    %56 = arith.mulf %54, %55 : vector<8x256xf32>
    %57 = tpu.concatenate %38, %39, %42, %45, %46, %49, %52, %53, %56 in 0 : vector<8x256xf32>, vector<8x256xf32>, vector<8x256xf32>, vector<8x256xf32>, vector<8x256xf32>, vector<8x256xf32>, vector<8x256xf32>, vector<8x256xf32>, vector<8x256xf32> -> vector<72x256xf32>
    %58 = tpu.concatenate %33, %57 in 1 : vector<72x256xf32>, vector<72x256xf32> -> vector<72x512xf32>
    %c0_13 = arith.constant 0 : index
    %c0_14 = arith.constant 0 : index
    %59 = vector.load %arg5[%c0_13, %c0_14] : memref<16x72xf32, #tpu.memory_space<vmem>>, vector<16x72xf32>
    %cst = arith.constant dense<0.000000e+00> : vector<16x512xf32>
    %60 = tpu.matmul %59, %58, %cst {dimension_numbers = #tpu.dot_dimension_numbers<[1], [0], [0], [1], [0, 0, 1, 1], [], []>} : vector<16x72xf32>, vector<72x512xf32>, vector<16x512xf32> -> vector<16x512xf32>
    %61 = vector.extract_strided_slice %60 {offsets = [0, 0], sizes = [8, 512], strides = [1, 1]} : vector<16x512xf32> to vector<8x512xf32>
    %c0_i32_15 = arith.constant 0 : i32
    %62 = arith.cmpi eq, %arg0, %c0_i32_15 : i32
    %63 = arith.extui %62 : i1 to i32
    %c0_i32_16 = arith.constant 0 : i32
    %64 = arith.cmpi ne, %63, %c0_i32_16 : i32
    scf.if %64 {
      %cst_21 = arith.constant dense<0.000000e+00> : vector<8xf32>
      %73 = vector.multi_reduction <add>, %61, %cst_21 [1] : vector<8x512xf32> to vector<8xf32>
      %74 = vector.shape_cast %73 : vector<8xf32> to vector<8x1xf32>
      %75 = arith.mulf %61, %61 : vector<8x512xf32>
      %cst_22 = arith.constant dense<0.000000e+00> : vector<8xf32>
      %76 = vector.multi_reduction <add>, %75, %cst_22 [1] : vector<8x512xf32> to vector<8xf32>
      %77 = vector.shape_cast %76 : vector<8xf32> to vector<8x1xf32>
      %c0_23 = arith.constant 0 : index
      %c0_24 = arith.constant 0 : index
      %78 = vector.load %arg8[%c0_23, %c0_24] : memref<16x1xf32, #tpu.memory_space<vmem>>, vector<16x1xf32>
      %79 = tpu.concatenate %74, %77 in 0 : vector<8x1xf32>, vector<8x1xf32> -> vector<16x1xf32>
      %80 = arith.addf %78, %79 : vector<16x1xf32>
      %c0_25 = arith.constant 0 : index
      %c0_26 = arith.constant 0 : index
      %81 = vector.load %arg8[%c0_25, %c0_26] : memref<16x1xf32, #tpu.memory_space<vmem>>, vector<16x1xf32>
      tpu.vector_store %arg8[%c0_25, %c0_26], %80 {strides = array<i32>} : memref<16x1xf32, #tpu.memory_space<vmem>>, vector<16x1xf32>,
    } else {
    }
    %c0_i32_17 = arith.constant 0 : i32
    %65 = arith.cmpi eq, %arg0, %c0_i32_17 : i32
    %c0_i32_18 = arith.constant 0 : i32
    %66 = arith.cmpi eq, %arg1, %c0_i32_18 : i32
    %67 = arith.andi %65, %66 : i1
    %68 = arith.extui %67 : i1 to i32
    %c0_i32_19 = arith.constant 0 : i32
    %69 = arith.cmpi ne, %68, %c0_i32_19 : i32
    scf.if %69 {
      %c0_21 = arith.constant 0 : index
      %c0_22 = arith.constant 0 : index
      %73 = vector.load %arg8[%c0_21, %c0_22] : memref<16x1xf32, #tpu.memory_space<vmem>>, vector<16x1xf32>
      %74 = vector.extract_strided_slice %73 {offsets = [0, 0], sizes = [8, 1], strides = [1, 1]} : vector<16x1xf32> to vector<8x1xf32>
      %cst_23 = arith.constant 0.001953125 : f32
      %75 = vector.broadcast %cst_23 : f32 to vector<8x1xf32>
      %76 = arith.mulf %74, %75 : vector<8x1xf32>
      %77 = vector.extract_strided_slice %73 {offsets = [8, 0], sizes = [8, 1], strides = [1, 1]} : vector<16x1xf32> to vector<8x1xf32>
      %cst_24 = arith.constant 0.001953125 : f32
      %78 = vector.broadcast %cst_24 : f32 to vector<8x1xf32>
      %79 = arith.mulf %77, %78 : vector<8x1xf32>
      %80 = arith.mulf %76, %76 : vector<8x1xf32>
      %81 = arith.subf %79, %80 : vector<8x1xf32>
      %cst_25 = arith.constant 0.000000e+00 : f32
      %82 = vector.broadcast %cst_25 : f32 to vector<8x1xf32>
      %83 = arith.maximumf %81, %82 : vector<8x1xf32>
      %c0_26 = arith.constant 0 : index
      %c0_27 = arith.constant 0 : index
      %84 = vector.load %arg3[%c0_26, %c0_27] : memref<16x1xf32, #tpu.memory_space<vmem>>, vector<16x1xf32>
      %85 = vector.extract_strided_slice %84 {offsets = [0, 0], sizes = [8, 1], strides = [1, 1]} : vector<16x1xf32> to vector<8x1xf32>
      %cst_28 = arith.constant 9.99999974E-6 : f32
      %86 = vector.broadcast %cst_28 : f32 to vector<8x1xf32>
      %87 = arith.addf %83, %86 : vector<8x1xf32>
      %88 = math.rsqrt %87 : vector<8x1xf32>
      %89 = arith.mulf %85, %88 : vector<8x1xf32>
      %90 = vector.extract_strided_slice %84 {offsets = [8, 0], sizes = [8, 1], strides = [1, 1]} : vector<16x1xf32> to vector<8x1xf32>
      %91 = arith.mulf %76, %89 : vector<8x1xf32>
      %92 = arith.subf %90, %91 : vector<8x1xf32>
      %93 = tpu.concatenate %89, %92 in 0 : vector<8x1xf32>, vector<8x1xf32> -> vector<16x1xf32>
      %c0_29 = arith.constant 0 : index
      %c0_30 = arith.constant 0 : index
      %94 = vector.load %arg8[%c0_29, %c0_30] : memref<16x1xf32, #tpu.memory_space<vmem>>, vector<16x1xf32>
      tpu.vector_store %arg8[%c0_29, %c0_30], %93 {strides = array<i32>} : memref<16x1xf32, #tpu.memory_space<vmem>>, vector<16x1xf32>,
    } else {
    }
    %c1_i32 = arith.constant 1 : i32
    %70 = arith.cmpi eq, %arg0, %c1_i32 : i32
    %71 = arith.extui %70 : i1 to i32
    %c0_i32_20 = arith.constant 0 : i32
    %72 = arith.cmpi ne, %71, %c0_i32_20 : i32
    scf.if %72 {
      %c0_21 = arith.constant 0 : index
      %c0_22 = arith.constant 0 : index
      %73 = vector.load %arg8[%c0_21, %c0_22] : memref<16x1xf32, #tpu.memory_space<vmem>>, vector<16x1xf32>
      %74 = vector.extract_strided_slice %73 {offsets = [0, 0], sizes = [8, 1], strides = [1, 1]} : vector<16x1xf32> to vector<8x1xf32>
      %75 = vector.extract_strided_slice %73 {offsets = [8, 0], sizes = [8, 1], strides = [1, 1]} : vector<16x1xf32> to vector<8x1xf32>
      %76 = vector.extract_strided_slice %60 {offsets = [8, 0], sizes = [8, 512], strides = [1, 1]} : vector<16x512xf32> to vector<8x512xf32>
      %77 = vector.broadcast %74 : vector<8x1xf32> to vector<8x512xf32>
      %78 = arith.mulf %61, %77 : vector<8x512xf32>
      %79 = vector.broadcast %75 : vector<8x1xf32> to vector<8x512xf32>
      %80 = arith.addf %78, %79 : vector<8x512xf32>
      %cst_23 = arith.constant 0.000000e+00 : f32
      %81 = vector.broadcast %cst_23 : f32 to vector<8x512xf32>
      %82 = arith.maximumf %80, %81 : vector<8x512xf32>
      %83 = arith.addf %82, %76 : vector<8x512xf32>
      %cst_24 = arith.constant 0.000000e+00 : f32
      %84 = vector.broadcast %cst_24 : f32 to vector<8x512xf32>
      %85 = arith.maximumf %83, %84 : vector<8x512xf32>
      %86 = vector.extract_strided_slice %85 {offsets = [0, 0], sizes = [8, 256], strides = [1, 1]} : vector<8x512xf32> to vector<8x256xf32>
      %c0_25 = arith.constant 0 : index
      %c0_26 = arith.constant 0 : index
      %c0_27 = arith.constant 0 : index
      %87 = vector.load %arg6[%c0_25, %c0_26, %c0_27] : memref<2x8x256xf32, #tpu.memory_space<vmem>>, vector<1x8x256xf32>
      %88 = vector.shape_cast %87 : vector<1x8x256xf32> to vector<8x256xf32>
      %89 = vector.shape_cast %86 : vector<8x256xf32> to vector<1x8x256xf32>
      tpu.vector_store %arg6[%c0_25, %c0_26, %c0_27], %89 {strides = array<i32>} : memref<2x8x256xf32, #tpu.memory_space<vmem>>, vector<1x8x256xf32>,
      %90 = vector.extract_strided_slice %85 {offsets = [0, 256], sizes = [8, 256], strides = [1, 1]} : vector<8x512xf32> to vector<8x256xf32>
      %c1_28 = arith.constant 1 : index
      %c0_29 = arith.constant 0 : index
      %c0_30 = arith.constant 0 : index
      %91 = vector.load %arg6[%c1_28, %c0_29, %c0_30] : memref<2x8x256xf32, #tpu.memory_space<vmem>>, vector<1x8x256xf32>
      %92 = vector.shape_cast %91 : vector<1x8x256xf32> to vector<8x256xf32>
      %93 = vector.shape_cast %90 : vector<8x256xf32> to vector<1x8x256xf32>
      tpu.vector_store %arg6[%c1_28, %c0_29, %c0_30], %93 {strides = array<i32>} : memref<2x8x256xf32, #tpu.memory_space<vmem>>, vector<1x8x256xf32>,
    } else {
    }
    return
  }
  func.func @transform_0(%arg0: i32, %arg1: i32) -> (i32, i32) {
    %c0_i32 = arith.constant 0 : i32
    %c0_i32_0 = arith.constant 0 : i32
    %c0_i32_1 = arith.constant 0 : i32
    return %c0_i32, %c0_i32_0 : i32, i32
  }
  func.func @transform_1(%arg0: i32, %arg1: i32) -> (i32, i32) {
    %c0_i32 = arith.constant 0 : i32
    %c0_i32_0 = arith.constant 0 : i32
    %c0_i32_1 = arith.constant 0 : i32
    return %c0_i32, %c0_i32_0 : i32, i32
  }
  func.func @transform_2(%arg0: i32, %arg1: i32) -> (i32, i32, i32) {
    %c0_i32 = arith.constant 0 : i32
    %c0_i32_0 = arith.constant 0 : i32
    %c0_i32_1 = arith.constant 0 : i32
    return %arg1, %c0_i32, %c0_i32_0 : i32, i32, i32
  }
  func.func @transform_3(%arg0: i32, %arg1: i32) -> (i32, i32) {
    %c0_i32 = arith.constant 0 : i32
    %c0_i32_0 = arith.constant 0 : i32
    %c0_i32_1 = arith.constant 0 : i32
    return %c0_i32, %c0_i32_0 : i32, i32
  }
  func.func @transform_4(%arg0: i32, %arg1: i32) -> (i32, i32, i32) {
    %c0_i32 = arith.constant 0 : i32
    %c0_i32_0 = arith.constant 0 : i32
    %c0_i32_1 = arith.constant 0 : i32
    return %arg1, %c0_i32, %c0_i32_0 : i32, i32, i32
  }
}

</mosaic_0001>

<bundles_post_ra>
// kernel: residual_block.1
= control target key start
LH: loop header
LB: loop body
LE: loop exit
PB: predicated region body
PF: predicated region fallthrough
CT: control target
= control target key end

     0   :  { %s1347_s15 = smov 0   ;;  %s1349_s16 = smov 0   ;;  %s1882_s0 = inlined_call_operand.vmem [shape: f32[2,256], index: 0, kind: input, shape index: {}]   ;;  %s1883_s1 = inlined_call_operand.vmem [shape: f32[16,1], index: 1, kind: input, shape index: {}]   ;;  %s1884_s2 = inlined_call_operand.vmem [shape: f32[2,8,256], index: 2, kind: input, shape index: {}]   ;;  %s1885_s3 = inlined_call_operand.vmem [shape: f32[16,72], index: 3, kind: input, shape index: {}]   ;;  %s1886_s4 = inlined_call_operand.vmem [shape: f32[2,8,256], index: 4, kind: output, shape index: {}]  }
   0x1   :  { %s1351_s17 = smov 0  }
   0x2 LB: > { %s26_s18 = sadd.s32 1, %s1302_s16  ;;  %p974_p0 = scmp.ge.s32.totalorder %s1306_s17, 1  ;;  %s1306_s17 = sphi %s1351_s17, %s14_s17   ;;  %s1302_s16 = sphi %s1349_s16, %s1888_s16   ;;  %s1298_s15 = sphi %s1347_s15, %s1887_s15  }
   0x3   : > { %p28_p1 = scmp.ge.s32.totalorder %s26_s18, 2  ;;  %p176_p2 = scmp.lt.s32.totalorder %s1306_s17, 3 }
   0x5   : > { %s1890_s18 = smov (%p28_p1, %s26_s18), 0  ;;  %p177_p3 = pnand %p974_p0, %p176_p2 }
   0x6   : > { %p218_p4 = scmp.eq.s32.totalorder (!%p177_p3), %s1298_s15, 0 }
   0x7   : > { %180 = sbr.rel (%p177_p3) target bundleno = 930 (0x3a2), region = 36 }
   0xc   : > { %223 = sbr.rel (!%p218_p4) target bundleno = 19 (0x13), region = 40  ;;  %v1308_v0 = vmov (%p218_p4), 0.0   ;;  %vm232_vm0 = vcmask (%p218_p4), 7168  }
   0xd   : > { %224 = vst [vmem:[#allocation2 + $0x30] sm:$0xff] (%p218_p4), %v1308_v0 }
   0xe   : > { %227 = vst [vmem:[#allocation2 + $0x10] sm:$0xff] (%p218_p4), %v1308_v0 }
   0xf   : > { %228 = vst [vmem:[#allocation2 + $0x8] sm:$0xff] (%p218_p4), %v1308_v0 }
  0x10   : > { %231 = vst [vmem:[#allocation2 + $0x38] sm:$0xff] (%p218_p4), %v1308_v0 }
  0x11   : > { %233 = vst.msk [vmem:[#allocation3] sm:$0xff] %vm232_vm0, %v1308_v0 }
  0x12   : > { %234 = vst.msk [vmem:[#allocation3 + $0x8] sm:$0xff] %vm232_vm0, %v1308_v0 }
  0x13 PF: > { %v243_v1 = vld [vmem:[%s1882_s0] sm:$0xf]  ;;  %v1376_v4 = vld [vmem:[%s1884_s2 + $0x8] sm:$0xff]  ;;  %s1309_s23 = smov 113   ;;  %s1310_s24 = smov 111   ;;  %v1389_v12 = vld [vmem:[%s1884_s2 + $0x18] sm:$0xff] }
  0x14   : > { %v269_v2 = vperm.slane %v243_v1, 1  ;;  %v249_v3 = vperm.slane %v243_v1, 0  ;;  %v270_v7 = vperm.slane %v243_v1, 3  ;;  %v250_v8 = vperm.slane %v243_v1, 2  ;;  %v1382_v9 = vld [vmem:[%s1884_s2] sm:$0xff]  ;;  %s1311_s27 = smov 127  }
  0x15   : > { %v1395_v13 = vld [vmem:[%s1884_s2 + $0x10] sm:$0xff]  ;;  %s1312_s6 = smov 1   ;;  %s1313_s7 = smov 15   ;;  %v1041_v18 = vpack.i.bf16 %v1376_v4, %v1382_v9  ;;  %vm261_vm1 = vcmask 908288   ;;  %vm281_vm2 = vcmask 924672   ;;  %vm317_vm3 = vcmask 121856  }
  0x16   : > { %v273_v5 = vperm.slane %v269_v2, 1  ;;  %v253_v6 = vperm.slane %v249_v3, 0  ;;  %v274_v10 = vperm.slane %v270_v7, 1  ;;  %v254_v11 = vperm.slane %v250_v8, 0  ;;  %s1314_s8 = smov 17   ;;  %v1401_v15 = vld [vmem:[#allocation2 + $0x30] sm:$0xff] }
  0x17   : > { %v1031_v17 = vpack.i.bf16 %v1382_v9, %v1401_v15  ;;  %s1315_s9 = smov 95   ;;  %v247_v21 = vld [vmem:[#allocation2 + $0x10] sm:$0xff]  ;;  %v1061_v23 = vpack.i.bf16 %v1389_v12, %v1395_v13  ;;  %s1316_s10 = smov 112   ;;  %vm293_vm4 = vcmask 1039360   ;;  %vm329_vm5 = vcmask 138240  }
  0x18   : > { %277 = vrot.lane.b32.xlu1 %v273_v5, %s1309_s23  ;;  %257 = vrot.lane.b32.xlu0 %v253_v6, %s1310_s24  ;;  %v1398_v14 = vld [vmem:[#allocation2 + $0x8] sm:$0xff]  ;;  %v1051_v22 = vpack.i.bf16 %v1395_v13, %v247_v21  ;;  %s1317_s11 = smov 126   ;;  %s1318_s12 = smov 94   ;;  %vm305_vm6 = vcmask 7168   ;;  %vm408_vm7 = vcmask 777216   ;;  %vm357_vm8 = vcmask 1031168  }
  0x19   : > { %289 = vrot.lane.b32.xlu2 %v253_v6, %s1311_s27  ;;  %v1036_v16 = vpack.i.bf16 %v1398_v14, %v1376_v4  ;;  %v1411_v19 = vld [vmem:[#allocation2 + $0x38] sm:$0xff]  ;;  %s1319_s13 = smov 110   ;;  %s1320_s14 = smov 96   ;;  %vm420_vm9 = vcmask 769024   ;;  %vm398_vm10 = vcmask 785408   ;;  %vm386_vm11 = vcmask 900096  }
  0x1a   : > { %v1056_v20 = vpack.i.bf16 %v1411_v19, %v1389_v12  ;;  %vm369_vm12 = vcmask 916480   ;;  %vm714_vm13 = vcmask 588800   ;;  %p984_p5 = scmp.ne.s32.totalorder %s1298_s15, 0 }
  0x20   : > { %279 = vrot.lane.b32.xlu1 %v274_v10, %s1309_s23  ;;  %259 = vrot.lane.b32.xlu0 %v254_v11, %s1310_s24 }
  0x21   : > { %291 = vrot.lane.b32.xlu2 %v254_v11, %s1311_s27 }
  0x28   : > { %303 = vrot.lane.b32.xlu1 %v274_v10, %s1312_s6  ;;  %301 = vrot.lane.b32.xlu0 %v273_v5, %s1312_s6 }
  0x29   : > { %313 = vrot.lane.b32.xlu2 %v253_v6, %s1313_s7 }
  0x30   : > { %325 = vrot.lane.b32.xlu1 %v273_v5, %s1314_s8  ;;  %315 = vrot.lane.b32.xlu0 %v254_v11, %s1313_s7 }
  0x31   : > { %327 = vrot.lane.b32.xlu2 %v274_v10, %s1314_s8 }
  0x38   : > { %1037 = vrot.lane.b32.xlu1 %v1036_v16, %s1311_s27  ;;  %1032 = vrot.lane.b32.xlu0 %v1031_v17, %s1311_s27 }
  0x39   : > { %1047 = vrot.lane.b32.xlu2 %v1041_v18, %s1315_s9 }
  0x40   : > { %1042 = vrot.lane.b32.xlu0 %v1041_v18, %s1310_s24  ;;  %1057 = vrot.lane.b32.xlu1 %v1056_v20, %s1315_s9 }
  0x48   : > { %1052 = vrot.lane.b32.xlu0 %v1051_v22, %s1315_s9  ;;  %1062 = vrot.lane.b32.xlu1 %v1061_v23, %s1310_s24 }
  0x50   : > { %1067 = vrot.lane.b32.xlu1 %v1061_v23, %s1311_s27 }
  0x73   : > { %v290_v24 = vpop.permute.xlu2 %289 }
  0x74   : > { %v434_v25 = vmul.f32 %v1398_v14, %v290_v24  ;;  %v298_v2 = vmul.f32 %v290_v24, %v1401_v15 }
  0x7b   : > { %v1422_v26 = vpop.permute.xlu2 %291 }
  0x7c   : > { %v300_v27 = vmul.f32 %v1422_v26, %v1376_v4  ;;  %v294_v63 = vsel %vm293_vm4, %v290_v24, %v1422_v26 }
  0x7d   : > { %v299_v3 = vmul.f32 %v294_v63, %v1382_v9 }
  0x7e   : > { %v1076_v28 = vpack.i.bf16 %v434_v25, %v300_v27 }
  0x7f   : > { %v1101_v20 = vpack.i.bf16 %v299_v3, %v298_v2 }
  0x80   : > { %1077 = vrot.lane.b32.xlu2 %v1076_v28, %s1316_s10 }
  0x83   : > { %v314_v29 = vpop.permute.xlu2 %313 }
  0x84   : > { %v322_v56 = vmul.f32 %v314_v29, %v1382_v9  ;;  %v440_v57 = vmul.f32 %v314_v29, %v1395_v13 }
  0x8a   : > { %v278_v30 = vpop.permute.xlu1 %277  ;;  %v1427_v31 = vpop.permute.xlu0 %257 }
  0x8b   : > { %v431_v32 = vmul.f32 %v1398_v14, %v278_v30  ;;  %v328_v39 = vpop.permute.xlu2 %327  ;;  %v286_v51 = vmul.f32 %v278_v30, %v1401_v15  ;;  %v266_v10 = vmul.f32 %v1427_v31, %v1401_v15 }
  0x8c   : > { %v336_v42 = vmul.f32 %v328_v39, %v247_v21  ;;  %v445_v43 = vmul.f32 %v1411_v19, %v328_v39 }
  0x8e   : > { %v1091_v47 = vpack.i.bf16 %v336_v42, %v445_v43 }
  0x92   : > { %v1430_v33 = vpop.permute.xlu1 %279  ;;  %v1432_v34 = vpop.permute.xlu0 %259 }
  0x93   : > { %v288_v35 = vmul.f32 %v1430_v33, %v1376_v4  ;;  %v1439_v36 = vsel %vm261_vm1, %v1427_v31, %v1432_v34  ;;  %v1447_v38 = vmul.f32 %v1432_v34, %v1376_v4  ;;  %v282_v50 = vsel %vm281_vm2, %v278_v30, %v1430_v33 }
  0x94   : > { %v1443_v37 = vmul.f32 %v1439_v36, %v1382_v9  ;;  %v287_v52 = vmul.f32 %v282_v50, %v1382_v9  ;;  %v432_v28 = vmul.f32 %v282_v50, %v1395_v13  ;;  %v428_v50 = vmul.f32 %v1398_v14, %v1427_v31  ;;  %v1531_v14 = vpop.permute.xlu2 %1047 }
  0x95   : > { %v1071_v40 = vpack.i.bf16 %v431_v32, %v288_v35  ;;  %v1050_v31 = vunpack.i.h.bf16 %v1531_v14 }
  0x96   : > { %v1276_v41 = vpack.i.bf16 %v1447_v38, %v1443_v37  ;;  %v1096_v61 = vpack.i.bf16 %v287_v52, %v286_v51 }
  0x97   : > { %1072 = vrot.lane.b32.xlu0 %v1071_v40, %s1317_s11  ;;  %v435_v40 = vmul.f32 %v294_v63, %v1395_v13 }
  0x9a   : > { %v304_v44 = vpop.permute.xlu1 %303  ;;  %v302_v45 = vpop.permute.xlu0 %301 }
  0x9b   : > { %v312_v46 = vmul.f32 %v304_v44, %v247_v21  ;;  %v437_v48 = vmul.f32 %v302_v45, %v1395_v13  ;;  %v306_v1 = vsel %vm305_vm6, %v302_v45, %v304_v44  ;;  %v439_v11 = vmul.f32 %v1411_v19, %v304_v44 }
  0x9c   : > { %v438_v16 = vmul.f32 %v306_v1, %v1389_v12  ;;  %v310_v15 = vmul.f32 %v302_v45, %v1382_v9  ;;  %v311_v23 = vmul.f32 %v306_v1, %v1376_v4 }
  0x9d   : > { %v1081_v49 = vpack.i.bf16 %v437_v48, %v312_v46 }
  0x9e   : > { %v1131_v22 = vpack.i.bf16 %v439_v11, %v438_v16  ;;  %v1106_v30 = vpack.i.bf16 %v311_v23, %v310_v15 }
  0x9f   : > { %1092 = vrot.lane.b32.xlu0 %v1091_v47, %s1318_s12  ;;  %1082 = vrot.lane.b32.xlu2 %v1081_v49, %s1319_s13 }
  0xa2   : > { %v326_v53 = vpop.permute.xlu1 %325  ;;  %v316_v54 = vpop.permute.xlu0 %315 }
  0xa3   : > { %v318_v55 = vsel %vm317_vm3, %v314_v29, %v316_v54  ;;  %v324_v59 = vmul.f32 %v316_v54, %v247_v21  ;;  %v330_v0 = vsel %vm329_vm5, %v326_v53, %v328_v39  ;;  %v443_v5 = vmul.f32 %v326_v53, %v1395_v13 }
  0xa4   : > { %v323_v58 = vmul.f32 %v318_v55, %v1376_v4  ;;  %v444_v6 = vmul.f32 %v330_v0, %v1389_v12  ;;  %v441_v24 = vmul.f32 %v318_v55, %v1389_v12  ;;  %v442_v25 = vmul.f32 %v1411_v19, %v316_v54 }
  0xa5   : > { %v1086_v60 = vpack.i.bf16 %v440_v57, %v324_v59  ;;  %v433_v29 = vmul.f32 %v1430_v33, %v1389_v12  ;;  %v436_v19 = vmul.f32 %v1422_v26, %v1389_v12  ;;  %v334_v42 = vmul.f32 %v326_v53, %v1382_v9 }
  0xa6   : > { %v1111_v62 = vpack.i.bf16 %v323_v58, %v322_v56  ;;  %v1121_v21 = vpack.i.bf16 %v444_v6, %v443_v5  ;;  %v1126_v32 = vpack.i.bf16 %v442_v25, %v441_v24  ;;  %v335_v43 = vmul.f32 %v330_v0, %v1376_v4 }
  0xa7   : > { %1087 = vrot.lane.b32.xlu1 %v1086_v60, %s1320_s14  ;;  %1097 = vrot.lane.b32.xlu2 %v1096_v61, %s1317_s11  ;;  %v1141_v35 = vpack.i.bf16 %v433_v29, %v432_v28  ;;  %v1136_v48 = vpack.i.bf16 %v436_v19, %v435_v40  ;;  %v429_v4 = vmul.f32 %v1439_v36, %v1395_v13  ;;  %v1049_v56 = vunpack.i.l.bf16 %v1531_v14 }
  0xa8   : > { %1112 = vrot.lane.b32.xlu0 %v1111_v62, %s1320_s14  ;;  %v1116_v47 = vpack.i.bf16 %v335_v43, %v334_v42  ;;  %v1573_v24 = vmul.f32 %v1432_v34, %v1389_v12 }
  0xa9   : > { %v1146_v54 = vpack.i.bf16 %v429_v4, %v428_v50  ;;  %v409_v1 = vsel %vm408_vm7, %v1049_v56, %v1050_v31 }
  0xaa   : > { %v1473_v7 = vpop.permute.xlu1 %1037  ;;  %v1475_v8 = vpop.permute.xlu0 %1032 }
  0xab   : > { %v1039_v17 = vunpack.i.l.bf16 %v1473_v7  ;;  %v1040_v58 = vunpack.i.h.bf16 %v1473_v7  ;;  %v1035_v61 = vunpack.i.h.bf16 %v1475_v8  ;;  %v1034_v62 = vunpack.i.l.bf16 %v1475_v8 }
  0xad   : > { %v1484_v18 = vpack.i.bf16 %v266_v10, %v1039_v17  ;;  %v1553_v8 = vsel %vm293_vm4, %v1034_v62, %v1035_v61  ;;  %v1558_v11 = vsel %vm293_vm4, %v1035_v61, %v1039_v17 }
  0xaf   : > { %1102 = vrot.lane.b32.xlu1 %v1101_v20, %s1316_s10  ;;  %1122 = vrot.lane.b32.xlu2 %v1121_v21, %s1318_s12  ;;  %v1266_v20 = vpack.i.bf16 %v1558_v11, %v1553_v8 }
  0xb0   : > { %1132 = vrot.lane.b32.xlu0 %v1131_v22, %s1319_s13 }
  0xb2   : > { %v1493_v27 = vpop.permute.xlu0 %1042  ;;  %v1058_v39 = vpop.permute.xlu1 %1057 }
  0xb3   : > { %v1060_v44 = vunpack.i.h.bf16 %v1058_v39  ;;  %v1059_v45 = vunpack.i.l.bf16 %v1058_v39  ;;  %v1045_v63 = vunpack.i.h.bf16 %v1493_v27  ;;  %v1044_v0 = vunpack.i.l.bf16 %v1493_v27 }
  0xb5   : > { %v514_v9 = vsel %vm408_vm7, %v1059_v45, %v1060_v44  ;;  %v376_v16 = vsel %vm261_vm1, %v1044_v0, %v1045_v63 }
  0xb6   : > { %v1166_v21 = vpack.i.bf16 %v1045_v63, %v376_v16 }
  0xb7   : > { %1107 = vrot.lane.b32.xlu1 %v1106_v30, %s1319_s13  ;;  %1127 = vrot.lane.b32.xlu2 %v1126_v32, %s1320_s14 }
  0xb8   : > { %1142 = vrot.lane.b32.xlu0 %v1141_v35, %s1317_s11 }
  0xba   : > { %v1506_v33 = vpop.permute.xlu0 %1052  ;;  %v1517_v49 = vpop.permute.xlu1 %1062 }
  0xbb   : > { %v1055_v46 = vunpack.i.h.bf16 %v1506_v33  ;;  %v1065_v52 = vunpack.i.h.bf16 %v1517_v49  ;;  %v1064_v53 = vunpack.i.l.bf16 %v1517_v49  ;;  %v1054_v57 = vunpack.i.l.bf16 %v1506_v33 }
  0xbd   : > { %v513_v26 = vsel %vm408_vm7, %v1055_v46, %v1059_v45  ;;  %v483_v55 = vsel %vm261_vm1, %v1064_v53, %v1065_v52  ;;  %v410_v2 = vsel %vm408_vm7, %v1050_v31, %v1054_v57 }
  0xbe   : > { %v1151_v51 = vpack.i.bf16 %v514_v9, %v513_v26  ;;  %v1161_v13 = vpack.i.bf16 %v483_v55, %v1064_v53  ;;  %v1156_v3 = vpack.i.bf16 %v410_v2, %v409_v1 }
  0xbf   : > { %1117 = vrot.lane.b32.xlu1 %v1116_v47, %s1318_s12  ;;  %1137 = vrot.lane.b32.xlu2 %v1136_v48, %s1316_s10 }
  0xc2   : > { %v1529_v36 = vpop.permute.xlu1 %1067 }
  0xc3   : > { %v1070_v59 = vunpack.i.h.bf16 %v1529_v36  ;;  %v1069_v60 = vunpack.i.l.bf16 %v1529_v36 }
  0xc5   : > { %v455_v5 = vsel %vm293_vm4, %v1040_v58, %v1069_v60  ;;  %v456_v6 = vsel %vm293_vm4, %v1069_v60, %v1070_v59 }
  0xc6   : > { %v1171_v10 = vpack.i.bf16 %v456_v6, %v455_v5 }
  0xc7   : > { %1147 = vrot.lane.b32.xlu2 %v1146_v54, %s1314_s8  ;;  %1152 = vrot.lane.b32.xlu1 %v1151_v51, %s1314_s8 }
  0xcf   : > { %1162 = vrot.lane.b32.xlu2 %v1161_v13, %s1314_s8  ;;  %1157 = vrot.lane.b32.xlu1 %v1156_v3, %s1314_s8 }
  0xd7   : > { %1172 = vrot.lane.b32.xlu2 %v1171_v10, %s1314_s8  ;;  %1167 = vrot.lane.b32.xlu1 %v1166_v21, %s1314_s8 }
  0xda   : > { %v1567_v22 = vpop.permute.xlu2 %1077 }
  0xdb   : > { %v1079_v8 = vunpack.i.l.bf16 %v1567_v22 }
  0xf9   : > { %v1569_v15 = vpop.permute.xlu2 %1082 }
  0xfa   : > { %v1085_v54 = vunpack.i.h.bf16 %v1569_v15 }
 0x101   : > { %v1098_v7 = vpop.permute.xlu2 %1097 }
 0x102   : > { %v1100_v17 = vunpack.i.h.bf16 %v1098_v7  ;;  %v1099_v23 = vunpack.i.l.bf16 %v1098_v7 }
 0x104   : > { %v1576_v25 = vsel %vm357_vm8, %v1099_v23, %v1100_v17 }
 0x105   : > { %v1256_v28 = vpack.i.bf16 %v1576_v25, %v1573_v24 }
 0x109   : > { %v1073_v29 = vpop.permute.xlu0 %1072  ;;  %v1580_v32 = vpop.permute.xlu2 %1122 }
 0x10a   : > { %v1074_v30 = vunpack.i.l.bf16 %v1073_v29  ;;  %v1125_v35 = vunpack.i.h.bf16 %v1580_v32  ;;  %v1124_v39 = vunpack.i.l.bf16 %v1580_v32  ;;  %v1075_v10 = vunpack.i.h.bf16 %v1073_v29 }
 0x10c   : > { %v359_v40 = vsel %vm357_vm8, %v1100_v17, %v1074_v30  ;;  %v524_v12 = vsel %vm420_vm9, %v1124_v39, %v1125_v35 }
 0x10d   : > { %v1585_v19 = vpack.i.bf16 %v1074_v30, %v359_v40  ;;  %v1191_v34 = vpack.i.bf16 %v524_v12, %v1124_v39 }
 0x10f   : > { %1192 = vrot.lane.b32.xlu2 %v1191_v34, %s1314_s8 }
 0x111   : > { %v1093_v42 = vpop.permute.xlu0 %1092  ;;  %v1591_v43 = vpop.permute.xlu2 %1127 }
 0x112   : > { %v1129_v45 = vunpack.i.l.bf16 %v1591_v43  ;;  %v1095_v21 = vunpack.i.h.bf16 %v1093_v42  ;;  %v1094_v34 = vunpack.i.l.bf16 %v1093_v42 }
 0x114   : > { %v525_v27 = vsel %vm420_vm9, %v1125_v35, %v1094_v34 }
 0x115   : > { %v1196_v42 = vpack.i.bf16 %v1055_v46, %v525_v27 }
 0x119   : > { %v1088_v44 = vpop.permute.xlu1 %1087  ;;  %v1138_v13 = vpop.permute.xlu2 %1137 }
 0x11a   : > { %v1090_v47 = vunpack.i.h.bf16 %v1088_v44  ;;  %v1113_v48 = vpop.permute.xlu0 %1112  ;;  %v1140_v58 = vunpack.i.h.bf16 %v1138_v13  ;;  %v1139_v49 = vunpack.i.l.bf16 %v1138_v13  ;;  %v1084_v13 = vunpack.i.l.bf16 %v1569_v15 }
 0x11b   : > { %v1114_v26 = vunpack.i.l.bf16 %v1113_v48 }
 0x11c   : > { %v504_v9 = vsel %vm398_vm10, %v1090_v47, %v1129_v45  ;;  %v478_v63 = vsel %vm369_vm12, %v1139_v49, %v1140_v58 }
 0x11d   : > { %v1201_v4 = vpack.i.bf16 %v504_v9, %v1090_v47  ;;  %v1176_v50 = vpack.i.bf16 %v1114_v26, %v1065_v52  ;;  %v1080_v52 = vunpack.i.h.bf16 %v1567_v22  ;;  %v1089_v9 = vunpack.i.l.bf16 %v1088_v44 }
 0x11f   : > { %1177 = vrot.lane.b32.xlu0 %v1176_v50, %s1314_s8  ;;  %1202 = vrot.lane.b32.xlu2 %v1201_v4, %s1314_s8  ;;  %v477_v62 = vsel %vm369_vm12, %v1080_v52, %v1139_v49  ;;  %v1115_v4 = vunpack.i.h.bf16 %v1113_v48 }
 0x120   : > { %v1231_v3 = vpack.i.bf16 %v478_v63, %v477_v62 }
 0x121   : > { %v1601_v51 = vpop.permute.xlu1 %1102  ;;  %v400_v50 = vsel %vm398_vm10, %v1115_v4, %v1089_v9 }
 0x122   : > { %v1603_v53 = vpop.permute.xlu0 %1132 }
 0x123   : > { %v1134_v55 = vunpack.i.l.bf16 %v1603_v53 }
 0x125   : > { %v493_v31 = vsel %vm386_vm11, %v1085_v54, %v1134_v55 }
 0x126   : > { %v1216_v57 = vpack.i.bf16 %v493_v31, %v1085_v54  ;;  %v1130_v54 = vunpack.i.h.bf16 %v1591_v43  ;;  %v1104_v43 = vunpack.i.l.bf16 %v1601_v51 }
 0x128   : > { %1217 = vrot.lane.b32.xlu2 %v1216_v57, %s1314_s8  ;;  %v505_v46 = vsel %vm398_vm10, %v1129_v45, %v1130_v54  ;;  %v1105_v57 = vunpack.i.h.bf16 %v1601_v51 }
 0x129   : > { %v1108_v60 = vpop.permute.xlu1 %1107 }
 0x12a   : > { %v1109_v61 = vunpack.i.l.bf16 %v1108_v60  ;;  %v1143_v2 = vpop.permute.xlu0 %1142  ;;  %v1110_v48 = vunpack.i.h.bf16 %v1108_v60 }
 0x12b   : > { %v1145_v5 = vunpack.i.h.bf16 %v1143_v2  ;;  %v1144_v6 = vunpack.i.l.bf16 %v1143_v2 }
 0x12c   : > { %v1181_v1 = vpack.i.bf16 %v1109_v61, %v1140_v58  ;;  %v387_v32 = vsel %vm386_vm11, %v1109_v61, %v1110_v48  ;;  %v388_v33 = vsel %vm386_vm11, %v1110_v48, %v1084_v13  ;;  %v370_v58 = vsel %vm369_vm12, %v1104_v43, %v1105_v57 }
 0x12d   : > { %v466_v23 = vsel %vm357_vm8, %v1075_v10, %v1144_v6  ;;  %v467_v30 = vsel %vm357_vm8, %v1144_v6, %v1145_v5  ;;  %v1186_v39 = vpack.i.bf16 %v1044_v0, %v1145_v5  ;;  %v399_v0 = vsel %vm398_vm10, %v1114_v26, %v1115_v4 }
 0x12e   : > { %1182 = vrot.lane.b32.xlu0 %v1181_v1, %s1314_s8  ;;  %v1241_v29 = vpack.i.bf16 %v467_v30, %v466_v23  ;;  %v1226_v44 = vpack.i.bf16 %v400_v50, %v399_v0  ;;  %v1135_v26 = vunpack.i.h.bf16 %v1603_v53  ;;  %v1236_v31 = vpack.i.bf16 %v388_v33, %v387_v32  ;;  %v1654_v53 = vpop.permute.xlu2 %1147 }
 0x12f   : > { %v1246_v22 = vpack.i.bf16 %v370_v58, %v1070_v59 }
 0x130   : > { %1232 = vrot.lane.b32.xlu2 %v1231_v3, %s1314_s8  ;;  %v494_v11 = vsel %vm386_vm11, %v1134_v55, %v1135_v26 }
 0x131   : > { %v1118_v16 = vpop.permute.xlu1 %1117  ;;  %v1221_v15 = vpack.i.bf16 %v1049_v56, %v494_v11 }
 0x132   : > { %v1120_v7 = vunpack.i.h.bf16 %v1118_v16  ;;  %v1119_v17 = vunpack.i.l.bf16 %v1118_v16 }
 0x134   : > { %v421_v40 = vsel %vm420_vm9, %v1119_v17, %v1120_v7  ;;  %v422_v12 = vsel %vm420_vm9, %v1120_v7, %v1095_v21  ;;  %v1206_v35 = vpack.i.bf16 %v1119_v17, %v505_v46 }
 0x135   : > { %v1211_v47 = vpack.i.bf16 %v422_v12, %v421_v40 }
 0x136   : > { %1187 = vrot.lane.b32.xlu0 %v1186_v39, %s1314_s8  ;;  %v1661_v55 = vpop.permute.xlu2 %1162 }
 0x137   : > { %1212 = vrot.lane.b32.xlu1 %v1211_v47, %s1314_s8  ;;  %v1165_v47 = vunpack.i.h.bf16 %v1661_v55  ;;  %v1164_v9 = vunpack.i.l.bf16 %v1661_v55 }
 0x138   : > { %1242 = vrot.lane.b32.xlu2 %v1241_v29, %s1314_s8 }
 0x139   : > { %v1153_v51 = vpop.permute.xlu1 %1152  ;;  %v684_v13 = vsel %vm329_vm5, %v1164_v9, %v1165_v47 }
 0x13a   : > { %v1155_v3 = vunpack.i.h.bf16 %v1153_v51  ;;  %v1154_v5 = vunpack.i.l.bf16 %v1153_v51 }
 0x13c   : > { %v691_v27 = vsel %vm329_vm5, %v1154_v5, %v1155_v3 }
 0x13e   : > { %1197 = vrot.lane.b32.xlu0 %v1196_v42, %s1314_s8  ;;  %v1673_v14 = vpop.permute.xlu2 %1172 }
 0x13f   : > { %1227 = vrot.lane.b32.xlu1 %v1226_v44, %s1314_s8  ;;  %v1175_v48 = vunpack.i.h.bf16 %v1673_v14 }
 0x140   : > { %1267 = vrot.lane.b32.xlu2 %v1266_v20, %s1314_s8  ;;  %v371_v20 = vsel %vm369_vm12, %v1105_v57, %v1079_v8 }
 0x141   : > { %v1251_v45 = vpack.i.bf16 %v1079_v8, %v371_v20  ;;  %v1678_v49 = vpop.permute.xlu1 %1157  ;;  %v1174_v20 = vunpack.i.l.bf16 %v1673_v14 }
 0x142   : > { %v1160_v52 = vunpack.i.h.bf16 %v1678_v49  ;;  %v1159_v60 = vunpack.i.l.bf16 %v1678_v49 }
 0x144   : > { %v598_v2 = vsel %vm329_vm5, %v1159_v60, %v1160_v52 }
 0x146   : > { %1207 = vrot.lane.b32.xlu0 %v1206_v35, %s1314_s8 }
 0x147   : > { %1237 = vrot.lane.b32.xlu1 %v1236_v31, %s1314_s8 }
 0x149   : > { %v1686_v38 = vpop.permute.xlu1 %1167 }
 0x14a   : > { %v1170_v31 = vunpack.i.h.bf16 %v1686_v38  ;;  %v1169_v57 = vunpack.i.l.bf16 %v1686_v38  ;;  %v1752_v38 = vld [vmem:[%s1885_s3] sm:$0xff] }
 0x14e   : > { %1222 = vrot.lane.b32.xlu0 %v1221_v15, %s1314_s8 }
 0x14f   : > { %1252 = vrot.lane.b32.xlu1 %v1251_v45, %s1314_s8 }
 0x156   : > { %1247 = vrot.lane.b32.xlu0 %v1246_v22, %s1314_s8  ;;  %v1150_v22 = vunpack.i.h.bf16 %v1654_v53 }
 0x157   : > { %1262 = vrot.lane.b32.xlu1 %v1585_v19, %s1314_s8 }
 0x15e   : > { %1257 = vrot.lane.b32.xlu0 %v1256_v28, %s1314_s8 }
 0x15f   : > { %1277 = vrot.lane.b32.xlu1 %v1276_v41, %s1314_s8 }
 0x166   : > { %1272 = vrot.lane.b32.xlu0 %v1484_v18, %s1314_s8 }
 0x169   : > { %v1193_v36 = vpop.permute.xlu2 %1192 }
 0x16a   : > { %v1195_v56 = vunpack.i.h.bf16 %v1193_v36  ;;  %v1194_v59 = vunpack.i.l.bf16 %v1193_v36  ;;  %v1149_v36 = vunpack.i.l.bf16 %v1654_v53 }
 0x16c   : > { %v692_v19 = vsel %vm329_vm5, %v1194_v59, %v1195_v56  ;;  %v592_v59 = vsel %vm329_vm5, %v1169_v57, %v1170_v31 }
 0x16d   : > { %774 = vmatpush.msra.mxu2 %v692_v19  ;;  %v678_v19 = vsel %vm329_vm5, %v1174_v20, %v1175_v48 }
 0x179   : > { %v1680_v24 = vpop.permute.xlu2 %1202 }
 0x17a   : > { %v1205_v10 = vunpack.i.h.bf16 %v1680_v24  ;;  %v1204_v16 = vunpack.i.l.bf16 %v1680_v24 }
 0x17c   : > { %v688_v29 = vsel %vm329_vm5, %v1204_v16, %v1205_v10 }
 0x182   : > { %v1688_v41 = vpop.permute.xlu2 %1217 }
 0x183   : > { %v1220_v39 = vunpack.i.h.bf16 %v1688_v41  ;;  %v1219_v40 = vunpack.i.l.bf16 %v1688_v41 }
 0x185   : > { %v686_v44 = vsel %vm329_vm5, %v1219_v40, %v1220_v39 }
 0x18a   : > { %v1694_v63 = vpop.permute.xlu2 %1232 }
 0x18b   : > { %v1235_v50 = vunpack.i.h.bf16 %v1694_v63  ;;  %v1234_v42 = vunpack.i.l.bf16 %v1694_v63 }
 0x18d   : > { %v682_v43 = vsel %vm329_vm5, %v1234_v42, %v1235_v50 }
 0x191   : > { %v1682_v25 = vpop.permute.xlu0 %1177 }
 0x192   : > { %v1717_v0 = vpop.permute.xlu2 %1242  ;;  %v1179_v51 = vunpack.i.l.bf16 %v1682_v25  ;;  %v1180_v3 = vunpack.i.h.bf16 %v1682_v25 }
 0x193   : > { %v1245_v32 = vunpack.i.h.bf16 %v1717_v0  ;;  %v1244_v33 = vunpack.i.l.bf16 %v1717_v0 }
 0x194   : > { %v685_v25 = vsel %vm329_vm5, %v1165_v47, %v1179_v51 }
 0x1a0   : > { %v1684_v37 = vpop.permute.xlu0 %1182 }
 0x1a8   : > { %v1690_v18 = vpop.permute.xlu0 %1187 }
 0x1a9   : > { %v1213_v28 = vpop.permute.xlu1 %1212  ;;  %v1190_v49 = vunpack.i.h.bf16 %v1690_v18 }
 0x1aa   : > { %v1215_v61 = vunpack.i.h.bf16 %v1213_v28  ;;  %v1214_v62 = vunpack.i.l.bf16 %v1213_v28 }
 0x1ac   : > { %v600_v1 = vsel %vm329_vm5, %v1214_v62, %v1215_v61 }
 0x1ad   : > { %751 = vmatpush.msra.mxu1 %v600_v1 }
 0x1af   : > { %752 = vmatpush.msra.mxu1 %v598_v2 }
 0x1b0   : > { %v1198_v6 = vpop.permute.xlu0 %1197 }
 0x1b1   : > { %v1200_v21 = vunpack.i.h.bf16 %v1198_v6  ;;  %v1199_v7 = vunpack.i.l.bf16 %v1198_v6  ;;  %v1702_v17 = vpop.permute.xlu1 %1227 }
 0x1b2   : > { %v1230_v23 = vunpack.i.h.bf16 %v1702_v17  ;;  %v1229_v30 = vunpack.i.l.bf16 %v1702_v17 }
 0x1b3   : > { %v690_v12 = vsel %vm329_vm5, %v1200_v21, %v1154_v5  ;;  %v693_v34 = vsel %vm329_vm5, %v1195_v56, %v1199_v7  ;;  %v680_v56 = vsel %vm329_vm5, %v1244_v33, %v1245_v32  ;;  %v1184_v5 = vunpack.i.l.bf16 %v1684_v37 }
 0x1b4   : > { %775 = vmatpush.msra.mxu2 %v690_v12  ;;  %797 = vmatpush.msra.mxu3 %v693_v34  ;;  %v596_v4 = vsel %vm329_vm5, %v1229_v30, %v1230_v23  ;;  %v1185_v21 = vunpack.i.h.bf16 %v1684_v37  ;;  %v595_v41 = vsel %vm329_vm5, %v1180_v3, %v1229_v30  ;;  %v713_v37 = vld [vmem:[%s1885_s3 + $0x8] sm:$0xff]  ;;  %v591_v30 = vsel %vm329_vm5, %v1190_v49, %v1169_v57 }
 0x1b5   : > { %753 = vmatpush.msra.mxu1 %v596_v4  ;;  %v683_v55 = vsel %vm329_vm5, %v1235_v50, %v1184_v5  ;;  %v1268_v4 = vpop.permute.xlu2 %1267 }
 0x1b6   : > { %776 = vmatpush.msra.mxu2 %v688_v29  ;;  %798 = vmatpush.msra.mxu3 %v691_v27  ;;  %v1270_v27 = vunpack.i.h.bf16 %v1268_v4  ;;  %v1269_v0 = vunpack.i.l.bf16 %v1268_v4 }
 0x1b8   : > { %v1208_v54 = vpop.permute.xlu0 %1207  ;;  %777 = vmatpush.msra.mxu2 %v686_v44 }
 0x1b9   : > { %v1210_v46 = vunpack.i.h.bf16 %v1208_v54  ;;  %v1209_v35 = vunpack.i.l.bf16 %v1208_v54  ;;  %v1238_v26 = vpop.permute.xlu1 %1237 }
 0x1ba   : > { %v1240_v8 = vunpack.i.h.bf16 %v1238_v26  ;;  %v1239_v11 = vunpack.i.l.bf16 %v1238_v26  ;;  %778 = vmatpush.msra.mxu2 %v684_v13 }
 0x1bb   : > { %v599_v15 = vsel %vm329_vm5, %v1210_v46, %v1214_v62  ;;  %v689_v45 = vsel %vm329_vm5, %v1205_v10, %v1209_v35  ;;  %v676_v62 = vsel %vm329_vm5, %v1149_v36, %v1150_v22 }
 0x1bc   : > { %728 = vmatpush.msra.mxu0 %v599_v15  ;;  %779 = vmatpush.msra.mxu2 %v682_v43  ;;  %v594_v58 = vsel %vm329_vm5, %v1239_v11, %v1240_v8  ;;  %v593_v7 = vsel %vm329_vm5, %v1185_v21, %v1239_v11 }
 0x1bd   : > { %799 = vmatpush.msra.mxu3 %v689_v45  ;;  %754 = vmatpush.msra.mxu1 %v594_v58 }
 0x1be   : > { %780 = vmatpush.msra.mxu2 %v680_v56 }
 0x1bf   : > { %755 = vmatpush.msra.mxu1 %v592_v59 }
 0x1c0   : > { %v1223_v24 = vpop.permute.xlu0 %1222  ;;  %781 = vmatpush.msra.mxu2 %v678_v19 }
 0x1c1   : > { %v1225_v28 = vunpack.i.h.bf16 %v1223_v24  ;;  %v1224_v52 = vunpack.i.l.bf16 %v1223_v24  ;;  %v1253_v61 = vpop.permute.xlu1 %1252 }
 0x1c2   : > { %v1255_v1 = vunpack.i.h.bf16 %v1253_v61  ;;  %v1254_v2 = vunpack.i.l.bf16 %v1253_v61  ;;  %782 = vmatpush.msra.mxu2 %v676_v62 }
 0x1c3   : > { %v597_v6 = vsel %vm329_vm5, %v1225_v28, %v1159_v60  ;;  %v687_v10 = vsel %vm329_vm5, %v1220_v39, %v1224_v52  ;;  %980 = vmatmul.msk.f32.vlgmr.msra.gmra.mxu2 %vm714_vm13, %v1752_v38  ;;  %v1189_v60 = vunpack.i.l.bf16 %v1690_v18 }
 0x1c4   : > { %729 = vmatpush.msra.mxu0 %v597_v6  ;;  %800 = vmatpush.msra.mxu3 %v687_v10  ;;  %v590_v16 = vsel %vm329_vm5, %v1254_v2, %v1255_v1 }
 0x1c5   : > { %756 = vmatpush.msra.mxu1 %v590_v16  ;;  %v681_v40 = vsel %vm329_vm5, %v1245_v32, %v1189_v60 }
 0x1c6   : > { %730 = vmatpush.msra.mxu0 %v595_v41  ;;  %801 = vmatpush.msra.mxu3 %v685_v25 }
 0x1c8   : > { %v1248_v23 = vpop.permute.xlu0 %1247  ;;  %731 = vmatpush.msra.mxu0 %v593_v7  ;;  %802 = vmatpush.msra.mxu3 %v683_v55 }
 0x1c9   : > { %v1250_v18 = vunpack.i.h.bf16 %v1248_v23  ;;  %v1249_v39 = vunpack.i.l.bf16 %v1248_v23  ;;  %v1263_v17 = vpop.permute.xlu1 %1262 }
 0x1ca   : > { %v1265_v12 = vunpack.i.h.bf16 %v1263_v17  ;;  %v1264_v63 = vunpack.i.l.bf16 %v1263_v17  ;;  %732 = vmatpush.msra.mxu0 %v591_v30  ;;  %803 = vmatpush.msra.mxu3 %v681_v40 }
 0x1cb   : > { %v589_v34 = vsel %vm329_vm5, %v1250_v18, %v1254_v2  ;;  %v679_v47 = vsel %vm329_vm5, %v1175_v48, %v1249_v39  ;;  %981 = vmatmul.msk.f32.gmra.mxu2 %vm714_vm13, %v713_v37  ;;  %v585_v48 = vsel %vm329_vm5, %v1269_v0, %v1270_v27 }
 0x1cc   : > { %733 = vmatpush.msra.mxu0 %v589_v34  ;;  %804 = vmatpush.msra.mxu3 %v679_v47  ;;  %v588_v9 = vsel %vm329_vm5, %v1264_v63, %v1265_v12 }
 0x1cd   : > { %757 = vmatpush.msra.mxu1 %v588_v9 }
 0x1d0   : > { %v1258_v29 = vpop.permute.xlu0 %1257 }
 0x1d1   : > { %v1260_v50 = vunpack.i.h.bf16 %v1258_v29  ;;  %v1259_v42 = vunpack.i.l.bf16 %v1258_v29  ;;  %v1278_v54 = vpop.permute.xlu1 %1277 }
 0x1d2   : > { %v1280_v32 = vunpack.i.h.bf16 %v1278_v54  ;;  %v1279_v33 = vunpack.i.l.bf16 %v1278_v54 }
 0x1d3   : > { %v587_v44 = vsel %vm329_vm5, %v1260_v50, %v1264_v63  ;;  %v677_v14 = vsel %vm329_vm5, %v1150_v22, %v1259_v42 }
 0x1d4   : > { %734 = vmatpush.msra.mxu0 %v587_v44  ;;  %805 = vmatpush.msra.mxu3 %v677_v14  ;;  %v584_v31 = vsel %vm329_vm5, %v1279_v33, %v1280_v32 }
 0x1d5   : > { %982 = vmatmul.msk.f32.vlgmr.msra.gmra.mxu3 %vm714_vm13, %v1752_v38 }
 0x1d6   : > { %735 = vmatpush.msra.mxu0 %v585_v48 }
 0x1d8   : > { %v1273_v13 = vpop.permute.xlu0 %1272 }
 0x1d9   : > { %v1275_v46 = vunpack.i.h.bf16 %v1273_v13  ;;  %v1274_v35 = vunpack.i.l.bf16 %v1273_v13 }
 0x1db   : > { %v583_v26 = vsel %vm329_vm5, %v1275_v46, %v1279_v33  ;;  %v586_v53 = vsel %vm329_vm5, %v1270_v27, %v1274_v35 }
 0x1dc   : > { %736 = vmatpush.msra.mxu0 %v583_v26  ;;  %758 = vmatpush.msra.mxu1 %v586_v53 }
 0x1dd   : > { %976 = vmatmul.msk.f32.vlgmr.msra.gmra.mxu0 %vm714_vm13, %v1752_v38  ;;  %983 = vmatmul.msk.f32.gmra.mxu3 %vm714_vm13, %v713_v37 }
 0x1de   : > { %759 = vmatpush.msra.mxu1 %v584_v31 }
 0x1df   : > { %978 = vmatmul.msk.f32.vlgmr.msra.gmra.mxu1 %vm714_vm13, %v1752_v38 }
 0x1e5   : > { %977 = vmatmul.msk.f32.gmra.mxu0 %vm714_vm13, %v713_v37 }
 0x1e7   : > { %979 = vmatmul.msk.f32.gmra.mxu1 %vm714_vm13, %v713_v37 }
 0x246   : > { %v1811_v57 = vpop.f32.mrf.mxu2 }
 0x24e   : > { %v1813_v8 = vpop.f32.mrf.mxu2 }
 0x258   : > { %v1815_v11 = vpop.f32.mrf.mxu3 }
 0x25a   : > { %v1817_v20 = vpop.f32.mrf.mxu0 }
 0x25c   : > { %v1819_v15 = vpop.f32.mrf.mxu1 }
 0x260   : > { %v1821_v43 = vpop.f32.mrf.mxu3  ;;  %815 = sbr.rel (%p984_p5) target bundleno = 746 (0x2ea), region = 44 }
 0x262   : > { %v1823_v45 = vpop.f32.mrf.mxu0 }
 0x264   : > { %v1825_v58 = vpop.f32.mrf.mxu1 }
 0x265   : > { %v816_v22 = vadd.f32 %v1819_v15, %v1817_v20  ;;  %v821_v36 = vmul.f32 %v1817_v20, %v1817_v20  ;;  %v822_v56 = vmul.f32 %v1819_v15, %v1819_v15  ;;  %v823_v19 = vmul.f32 %v1811_v57, %v1811_v57  ;;  %v830_v61 = vld [vmem:[#allocation3] sm:$0xff]  ;;  %v831_v2 = vld [vmem:[#allocation3 + $0x8] sm:$0xff] }
 0x266   : > { %v824_v38 = vmul.f32 %v1815_v11, %v1815_v11 }
 0x267   : > { %v817_v59 = vadd.f32 %v816_v22, %v1811_v57  ;;  %v825_v51 = vadd.f32 %v822_v56, %v821_v36 }
 0x269   : > { %v818_v24 = vadd.f32 %v817_v59, %v1815_v11  ;;  %v826_v28 = vadd.f32 %v825_v51, %v823_v19 }
 0x26b   : > { %819 = vadd.xlane.f32.xlu0 %v818_v24  ;;  %v827_v52 = vadd.f32 %v826_v28, %v824_v38 }
 0x273   : > { %828 = vadd.xlane.f32.xlu0 %v827_v52 }
 0x2de   : > { %v820_v62 = vpop.xlane.xlu0 %819 }
 0x2df   : > { %v832_v1 = vadd.f32 %v830_v61, %v820_v62 }
 0x2e1   : > { %834 = vst.msk [vmem:[#allocation3] sm:$0xff] %vm305_vm6, %v832_v1 }
 0x2e6   : > { %v829_v3 = vpop.xlane.xlu0 %828 }
 0x2e7   : > { %v833_v5 = vadd.f32 %v831_v2, %v829_v3 }
 0x2e9   : > { %835 = vst.msk [vmem:[#allocation3 + $0x8] sm:$0xff] %vm305_vm6, %v833_v5 }
 0x2ea PF: > { %837 = sbr.rel (!%p218_p4) target bundleno = 786 (0x312), region = 48  ;;  %v838_v6 = vld [vmem:[#allocation3] sm:$0xff] (%p218_p4)  ;;  %v846_v12 = vld [vmem:[%s1883_s1 + $0x8] sm:$0xff] (%p218_p4) }
 0x2eb   : > { %v840_v16 = vmul.f32 (%p218_p4), 0.001953125, %v838_v6  ;;  %v845_v39 = vld [vmem:[%s1883_s1] sm:$0xff] (%p218_p4) }
 0x2ed   : > { %v842_v21 = vmul.f32 (%p218_p4), %v840_v16, %v840_v16 }
 0x2f0   : > { %v839_v10 = vld [vmem:[#allocation3 + $0x8] sm:$0xff] }
 0x2f1   : > { %v841_v25 = vmul.f32 0.001953125, %v839_v10 }
 0x2f3   : > { %v843_v49 = vsub.f32 %v841_v25, %v842_v21 }
 0x2f5   : > { %v844_v60 = vmax.f32 %v843_v49, 0.0 }
 0x2f7   : > { %v847_v41 = vadd.f32 1e-05, %v844_v60 }
 0x2f9   : > { %1281 = vrsqrt.f32 %v847_v41  ;;  %vm854_vm14 = vweird.f32 %v847_v41 }
 0x2ff   : > { %v1282_v7 = vpop.eup %1281 }
 0x300   : > { %v849_v55 = vmul.f32 %v1282_v7, %v847_v41  ;;  %vm855_vm15 = vweird.f32 %v1282_v7 }
 0x301   : > { %vm856_vm0 = vmor %vm854_vm14, %vm855_vm15 }
 0x302   : > { %v850_v23 = vmul.f32 %v1282_v7, %v849_v55 }
 0x304   : > { %v851_v37 = vmul.f32 0.5, %v850_v23 }
 0x306   : > { %v852_v18 = vsub.f32 1.5, %v851_v37 }
 0x308   : > { %v853_v17 = vmul.f32 %v1282_v7, %v852_v18 }
 0x30a   : > { %v857_v30 = vsel %vm856_vm0, %v1282_v7, %v853_v17 }
 0x30b   : > { %v858_v40 = vmul.f32 %v857_v30, %v845_v39 }
 0x30d   : > { %861 = vst.msk [vmem:[#allocation3] sm:$0xff] %vm305_vm6, %v858_v40  ;;  %v859_v63 = vmul.f32 %v858_v40, %v840_v16 }
 0x30f   : > { %v860_v34 = vsub.f32 %v846_v12, %v859_v63 }
 0x311   : > { %862 = vst.msk [vmem:[#allocation3 + $0x8] sm:$0xff] %vm305_vm6, %v860_v34 }
 0x312 PF: > { %p985_p6 = scmp.ne.s32.totalorder %s1298_s15, 1 }
 0x314   : > { %866 = sbr.rel (%p985_p6) target bundleno = 930 (0x3a2), region = 52 }
 0x319   : > { %v867_v47 = vld [vmem:[#allocation3] sm:$0xff]  ;;  %v1321_v9 = vmov 0   ;;  %v868_v4 = vld [vmem:[#allocation3 + $0x8] sm:$0xff] }
 0x31a   : > { %1283 = vset.pattern.permute.xlu0 %v1321_v9 }
 0x31b   : > { %871 = vperm.xlu0 %1283, %v867_v47  }
 0x323   : > { %880 = vperm.xlu0 %1283, %v868_v4  }
 0x38d   : > { %v872_v29 = vpop.permute.xlu0 %871 }
 0x38e   : > { %v874_v27 = vmul.f32 %v872_v29, %v1817_v20  ;;  %v875_v0 = vmul.f32 %v872_v29, %v1819_v15  ;;  %v876_v50 = vmul.f32 %v872_v29, %v1811_v57  ;;  %v877_v42 = vmul.f32 %v872_v29, %v1815_v11 }
 0x395   : > { %v881_v44 = vpop.permute.xlu0 %880 }
 0x396   : > { %v883_v14 = vadd.f32 %v881_v44, %v874_v27  ;;  %v884_v48 = vadd.f32 %v881_v44, %v875_v0  ;;  %v885_v54 = vadd.f32 %v881_v44, %v876_v50  ;;  %v886_v13 = vadd.f32 %v881_v44, %v877_v42 }
 0x398   : > { %v887_v32 = vmax.f32 %v883_v14, 0.0  ;;  %v888_v33 = vmax.f32 %v884_v48, 0.0  ;;  %v889_v46 = vmax.f32 %v885_v54, 0.0  ;;  %v890_v35 = vmax.f32 %v886_v13, 0.0 }
 0x39a   : > { %v891_v26 = vadd.f32 %v887_v32, %v1823_v45  ;;  %v892_v53 = vadd.f32 %v888_v33, %v1825_v58  ;;  %v893_v31 = vadd.f32 %v889_v46, %v1813_v8  ;;  %v894_v20 = vadd.f32 %v890_v35, %v1821_v43 }
 0x39c   : > { %v895_v57 = vmax.f32 %v891_v26, 0.0  ;;  %v896_v15 = vmax.f32 %v892_v53, 0.0  ;;  %v897_v11 = vmax.f32 %v893_v31, 0.0  ;;  %v898_v22 = vmax.f32 %v894_v20, 0.0 }
 0x39e   : > { %899 = vst [vmem:[%s1886_s4] sm:$0xff] %v895_v57 }
 0x39f   : > { %900 = vst [vmem:[%s1886_s4 + $0x8] sm:$0xff] %v896_v15 }
 0x3a0   : > { %986 = vst [vmem:[%s1886_s4 + $0x10] sm:$0xff] %v897_v11 }
 0x3a1   : > { %987 = vst [vmem:[%s1886_s4 + $0x18] sm:$0xff] %v898_v22 }
 0x3a2 PF: > { %s14_s17 = sadd.s32 1, %s1306_s17   ;;  %s1887_s15 = smov %s1302_s16 }
 0x3a3   : > { %p11_p7 = scmp.ge.s32.totalorder %s14_s17, 4   ;;  %s1888_s16 = smov %s1890_s18 }
 0x3a5   :  { %13 = sbr.rel (!%p11_p7) target bundleno = 2 (0x2), region = 84 }

</bundles_post_ra>
